<compile_context>
chip_gen: v7x
topology: tpu7x:2x2x1
jax: 0.10.0
libtpu: 0.0.40
codegen_flags: <defaults>
</compile_context>

<pallas_src>
import functools

import jax
import jax.numpy as jnp
from jax.experimental import pallas as pl
from jax.experimental.pallas import tpu as pltpu

BN_EPS = 1e-5


def _vmem_limit_bytes():
    """~75% of physical VMEM: ~48 MiB on v7x (64 MiB), ~96 MiB on v5e/v6e (128 MiB)."""
    try:
        cap = int(pltpu.get_tpu_info().vmem_capacity_bytes)
    except Exception:  # unknown chip / interpret mode
        cap = 128 * 1024 * 1024
    return max(32 * 1024 * 1024, (cap * 3) // 4)


def _bn_scale_shift(sum_row, sumsq_row, gamma, beta, inv_b):
    """Fold biased-variance BatchNorm + affine into per-feature (scale, shift) rows (f32)."""
    mean = sum_row * inv_b
    var = jnp.maximum(sumsq_row * inv_b - mean * mean, 0.0)
    scale = gamma * jax.lax.rsqrt(var + BN_EPS)
    return scale, beta - mean * scale


def _sigmoid(logits):
    # exp and the approximate reciprocal both run on the (otherwise idle) EUP slot.
    return pl.reciprocal(1.0 + jnp.exp(-logits), approx=True)


# ----------------------------------------------------------------------------------------
# Fast path: whole batch in one tile, single grid step.
# ----------------------------------------------------------------------------------------
def _disc_vec_kernel_fused(x_ref, w1_ref, g1_ref, b1_ref, w2_ref, g2_ref, b2_ref,
                           w3_ref, o_ref, *, batch):
    inv_b = 1.0 / float(batch)

    h1 = jnp.dot(x_ref[...], w1_ref[...], preferred_element_type=jnp.float32)  # (B, H) f32
    s1, t1 = _bn_scale_shift(jnp.sum(h1, axis=0, keepdims=True),
                             jnp.sum(h1 * h1, axis=0, keepdims=True),
                             g1_ref[...], b1_ref[...], inv_b)
    r1 = jnp.maximum(h1 * s1 + t1, 0.0)

    h2 = jnp.dot(r1.astype(jnp.bfloat16), w2_ref[...],
                 preferred_element_type=jnp.float32)                           # (B, H) f32
    s2, t2 = _bn_scale_shift(jnp.sum(h2, axis=0, keepdims=True),
                             jnp.sum(h2 * h2, axis=0, keepdims=True),
                             g2_ref[...], b2_ref[...], inv_b)
    r2 = jnp.maximum(h2 * s2 + t2, 0.0)

    # Final Linear(2C -> 1): VPU multiply + lane reduction (avoids an N=1 MXU matmul).
    logits = jnp.sum(r2 * w3_ref[...], axis=-1, keepdims=True)                 # (B, 1)
    o_ref[...] = _sigmoid(logits).astype(o_ref.dtype)


# ----------------------------------------------------------------------------------------
# Tiled path: grid = (phase, batch_tile). Phase 0/1 accumulate BN stats, phase 2 emits output.
# ----------------------------------------------------------------------------------------
def _disc_vec_kernel_tiled(x_ref, w1_ref, g1_ref, b1_ref, w2_ref, g2_ref, b2_ref,
                           w3_ref, o_ref,
                           sc1_ref, sh1_ref, sc2_ref, sh2_ref,
                           *, batch, tile, ragged):
    p = pl.program_id(0)  # 0: layer-1 stats, 1: layer-2 stats, 2: output
    i = pl.program_id(1)  # batch tile index
    inv_b = 1.0 / float(batch)

    # ---- phase boundaries (run once, on the first tile of each phase) --------------------
    @pl.when((p == 0) & (i == 0))
    def _init_accumulators():
        sc1_ref[...] = jnp.zeros_like(sc1_ref)
        sh1_ref[...] = jnp.zeros_like(sh1_ref)
        sc2_ref[...] = jnp.zeros_like(sc2_ref)
        sh2_ref[...] = jnp.zeros_like(sh2_ref)

    @pl.when((p == 1) & (i == 0))
    def _finalize_bn1():  # (sum, sumsq) -> folded (scale, shift), in place on (1, H) rows
        s, t = _bn_scale_shift(sc1_ref[...], sh1_ref[...], g1_ref[...], b1_ref[...], inv_b)
        sc1_ref[...] = s
        sh1_ref[...] = t

    @pl.when((p == 2) & (i == 0))
    def _finalize_bn2():
        s, t = _bn_scale_shift(sc2_ref[...], sh2_ref[...], g2_ref[...], b2_ref[...], inv_b)
        sc2_ref[...] = s
        sh2_ref[...] = t

    # ---- per-tile compute -----------------------------------------------------------------
    x = x_ref[...]                                    # bf16 (tile, C)
    if ragged:                                        # static: elided when B % tile == 0
        row = i * tile + jax.lax.broadcasted_iota(jnp.int32, (tile, 1), 0)
        in_bounds = row < batch
        # Zeroing x makes padded rows of h1 exactly zero -> layer-1 sums need no masking.
        x = jnp.where(in_bounds, x, jnp.zeros_like(x))

    # Layer 1 is needed in every phase (recompute-over-spill; see TODO at top for large C).
    h1 = jnp.dot(x, w1_ref[...], preferred_element_type=jnp.float32)           # (tile, H) f32

    @pl.when(p == 0)
    def _accumulate_layer1_stats():
        sc1_ref[...] += jnp.sum(h1, axis=0, keepdims=True)
        sh1_ref[...] += jnp.sum(h1 * h1, axis=0, keepdims=True)

    @pl.when(p == 1)
    def _accumulate_layer2_stats():
        r1 = jnp.maximum(h1 * sc1_ref[...] + sh1_ref[...], 0.0)
        if ragged:
            # Padded rows of r1 equal relu(shift) != 0: one (tile, H) select here keeps the
            # layer-2 sums exact (cheaper than masking h2 and h2*h2).
            r1 = jnp.where(in_bounds, r1, jnp.zeros_like(r1))
        h2 = jnp.dot(r1.astype(jnp.bfloat16), w2_ref[...],
                     preferred_element_type=jnp.float32)
        sc2_ref[...] += jnp.sum(h2, axis=0, keepdims=True)
        sh2_ref[...] += jnp.sum(h2 * h2, axis=0, keepdims=True)

    @pl.when(p == 2)
    def _emit_output():
        r1 = jnp.maximum(h1 * sc1_ref[...] + sh1_ref[...], 0.0)
        h2 = jnp.dot(r1.astype(jnp.bfloat16), w2_ref[...],
                     preferred_element_type=jnp.float32)
        r2 = jnp.maximum(h2 * sc2_ref[...] + sh2_ref[...], 0.0)
        logits = jnp.sum(r2 * w3_ref[...], axis=-1, keepdims=True)             # (tile, 1)
        # Padded rows are garbage but the ragged output block only writes in-bounds rows.
        o_ref[...] = _sigmoid(logits).astype(o_ref.dtype)


# ----------------------------------------------------------------------------------------
# Wrapper
# ----------------------------------------------------------------------------------------
def _weight_specs(index_map, C, H, single_buffer):
    """BlockSpecs for the grid-invariant operands: w1, g1, b1, w2, g2, b2, w3_row."""
    shapes = [(C, H), (1, H), (1, H), (H, H), (1, H), (1, H), (1, H)]
    if single_buffer:
        try:
            # Invariant blocks do not need double buffering; halving their VMEM footprint
            # matters most for w2 (H x H) against v7x's 64 MiB VMEM.
            return [pl.BlockSpec(s, index_map, pipeline_mode=pl.Buffered(1)) for s in shapes]
        except TypeError:
            pass  # older BlockSpec without pipeline_mode
    return [pl.BlockSpec(s, index_map) for s in shapes]


def _call_fused(x_bf16, w1, g1, b1, w2, g2, b2, w3_row, B, C, H, vmem_limit):
    kernel = functools.partial(_disc_vec_kernel_fused, batch=B)
    const = lambda i: (0, 0)
    return pl.pallas_call(
        kernel,
        out_shape=jax.ShapeDtypeStruct((B, 1), jnp.float32),
        grid_spec=pltpu.PrefetchScalarGridSpec(
            num_scalar_prefetch=0,
            grid=(1,),
            in_specs=[pl.BlockSpec((B, C), lambda i: (0, 0))]
                     + _weight_specs(const, C, H, single_buffer=False),
            out_specs=pl.BlockSpec((B, 1), lambda i: (0, 0)),
        ),
        compiler_params=pltpu.CompilerParams(
            dimension_semantics=("arbitrary",),
            vmem_limit_bytes=vmem_limit,
        ),
    )(x_bf16, w1, g1, b1, w2, g2, b2, w3_row)


def _call_tiled(x_bf16, w1, g1, b1, w2, g2, b2, w3_row, B, C, H, tb, nb,
                vmem_limit, single_buffer_weights):
    ragged = (B % tb) != 0
    kernel = functools.partial(_disc_vec_kernel_tiled, batch=B, tile=tb, ragged=ragged)
    const = lambda p, i: (0, 0)
    return pl.pallas_call(
        kernel,
        out_shape=jax.ShapeDtypeStruct((B, 1), jnp.float32),
        grid_spec=pltpu.PrefetchScalarGridSpec(
            num_scalar_prefetch=0,
            grid=(3, nb),  # (phase, batch tile) — both sequential (shared BN accumulators)
            in_specs=[pl.BlockSpec((tb, C), lambda p, i: (i, 0))]
                     + _weight_specs(const, C, H, single_buffer_weights),
            # p // 2 gates writeback: during the two stat phases the output block index
            # stays (0, 0) and is never written nor flushed; only phase 2 walks the tiles.
            out_specs=pl.BlockSpec((tb, 1), lambda p, i: (i * (p // 2), 0)),
            scratch_shapes=[pltpu.VMEM((1, H), jnp.float32)] * 4,
        ),
        compiler_params=pltpu.CompilerParams(
            dimension_semantics=("arbitrary", "arbitrary"),
            vmem_limit_bytes=vmem_limit,
        ),
    )(x_bf16, w1, g1, b1, w2, g2, b2, w3_row)


def discriminator_vector(x, params, *, batch_tile=1024):
    """x: (B, C) float; params: dict (see init_params). Returns (B, 1) float32 probabilities.

    batch_tile: rows per grid step of the multi-tile path (prefer multiples of 256 on
    v6e/v7x, 128 on v5e; re-derive against ~48 MiB usable VMEM on v7x for large C).
    """
    B, C = x.shape
    H = params["w1"].shape[1]            # = 2C

    # Cast once in the wrapper: bf16 x halves its HBM traffic and removes in-kernel casts;
    # weights bf16 for the MXU; BN params and w3 (VPU path) stay f32.
    x_bf16 = x.astype(jnp.bfloat16)
    w1 = params["w1"].astype(jnp.bfloat16)
    w2 = params["w2"].astype(jnp.bfloat16)
    w3_row = params["w3"].reshape(1, H).astype(jnp.float32)
    g1, b1, g2, b2 = params["g1"], params["b1"], params["g2"], params["b2"]
    vmem_limit = _vmem_limit_bytes()

    if B <= batch_tile:
        # Fast path: one grid step, no matmul recompute, no BN accumulator scratch.
        return _call_fused(x_bf16, w1, g1, b1, w2, g2, b2, w3_row, B, C, H, vmem_limit)

    tb = batch_tile
    nb = pl.cdiv(B, tb)
    try:
        return _call_tiled(x_bf16, w1, g1, b1, w2, g2, b2, w3_row, B, C, H, tb, nb,
                           vmem_limit, single_buffer_weights=True)
    except Exception:
        # pipeline_mode=pl.Buffered(1) rejected by this jax/libtpu: fall back to default
        # double-buffered invariant weights (correct, just a larger VMEM footprint).
        return _call_tiled(x_bf16, w1, g1, b1, w2, g2, b2, w3_row, B, C, H, tb, nb,
                           vmem_limit, single_buffer_weights=False)


# ----------------------------------------------------------------------------------------
# Params + pure-JAX reference
# ----------------------------------------------------------------------------------------
def init_params(key, outchannel):
    C, H = outchannel, outchannel * 2
    k1, k2, k3, k4, k5 = jax.random.split(key, 5)
    scale1 = 1.0 / jnp.sqrt(C)
    scale2 = 1.0 / jnp.sqrt(H)
    return {
        # stored as (in, out) = W_pytorch.T
        "w1": jax.random.uniform(k1, (C, H), jnp.float32, -scale1, scale1),
        "g1": 1.0 + 0.1 * jax.random.normal(k2, (1, H), jnp.float32),
        "b1": 0.1 * jax.random.normal(k3, (1, H), jnp.float32),
        "w2": jax.random.uniform(k4, (H, H), jnp.float32, -scale2, scale2),
        "g2": jnp.ones((1, H), jnp.float32),
        "b2": jnp.zeros((1, H), jnp.float32),
        "w3": jax.random.uniform(k5, (H, 1), jnp.float32, -scale2, scale2),
    }


def reference_forward(x, p, matmul_dtype=jnp.float32):
    """Pure-JAX reference.  matmul_dtype=bf16 mimics the kernel's MXU precision."""
    def mm(a, w):
        return jnp.dot(a.astype(matmul_dtype), w.astype(matmul_dtype),
                       preferred_element_type=jnp.float32)

    def bn_relu(h, g, b):
        m = jnp.mean(h, axis=0, keepdims=True)
        v = jnp.maximum(jnp.mean(h * h, axis=0, keepdims=True) - m * m, 0.0)
        scale = g * jax.lax.rsqrt(v + BN_EPS)
        return jnp.maximum(h * scale + (b - m * scale), 0.0)

    h = bn_relu(mm(x, p["w1"]), p["g1"], p["b1"])
    h = bn_relu(mm(h, p["w2"]), p["g2"], p["b2"])
    logits = jnp.sum(h * p["w3"].reshape(1, -1), axis=-1, keepdims=True)
    return jax.nn.sigmoid(logits)


if __name__ == "__main__":
    key = jax.random.PRNGKey(0)
    kx, kp = jax.random.split(key)

    B, C = 16, 32                      # batch=16, outchannel=32 (H = 64)
    x = jax.random.normal(kx, (B, C), jnp.float32)
    params = init_params(kp, C)

    ref_bf16 = reference_forward(x, params, matmul_dtype=jnp.bfloat16)
    ref_f32 = reference_forward(x, params, matmul_dtype=jnp.float32)

    # 1) Fast path (B <= batch_tile): single grid step.
    out = jax.block_until_ready(discriminator_vector(x, params))
    assert out.shape == (B, 1)
    assert bool(jnp.all(jnp.isfinite(out)))
    assert jnp.allclose(out, ref_bf16, atol=1e-2, rtol=1e-2), \
        float(jnp.max(jnp.abs(out - ref_bf16)))
    assert jnp.allclose(out, ref_f32, atol=5e-2, rtol=5e-2), \
        float(jnp.max(jnp.abs(out - ref_f32)))

    # 2) Tiled path, tile-aligned batch (mask code statically elided).
    out_t = jax.block_until_ready(discriminator_vector(x, params, batch_tile=8))
    assert out_t.shape == (B, 1)
    assert jnp.allclose(out_t, ref_bf16, atol=1e-2, rtol=1e-2), \
        float(jnp.max(jnp.abs(out_t - ref_bf16)))

    # 3) Tiled path, ragged last tile.
    B2 = 11
    x2 = jax.random.normal(kx, (B2, C), jnp.float32)
    ref2 = reference_forward(x2, params, matmul_dtype=jnp.bfloat16)
    out2 = jax.block_until_ready(discriminator_vector(x2, params, batch_tile=8))
    assert out2.shape == (B2, 1)
    assert jnp.allclose(out2, ref2, atol=1e-2, rtol=1e-2), \
        float(jnp.max(jnp.abs(out2 - ref2)))

    # 4) Fast path with a batch that is not a multiple of 8.
    out3 = jax.block_until_ready(discriminator_vector(x2, params))
    assert jnp.allclose(out3, ref2, atol=1e-2, rtol=1e-2), \
        float(jnp.max(jnp.abs(out3 - ref2)))

    print("KERNEL_OK")
</pallas_src>

<mosaic_0001>
module attributes {stable_mosaic.version = 11 : i64} {
  func.func @_disc_vec_kernel_fused(%arg0: i32, %arg1: memref<16x32xbf16, #tpu.memory_space<vmem>>, %arg2: memref<32x64xbf16, #tpu.memory_space<vmem>>, %arg3: memref<1x64xf32, #tpu.memory_space<vmem>>, %arg4: memref<1x64xf32, #tpu.memory_space<vmem>>, %arg5: memref<64x64xbf16, #tpu.memory_space<vmem>>, %arg6: memref<1x64xf32, #tpu.memory_space<vmem>>, %arg7: memref<1x64xf32, #tpu.memory_space<vmem>>, %arg8: memref<1x64xf32, #tpu.memory_space<vmem>>, %arg9: memref<16x1xf32, #tpu.memory_space<vmem>>) attributes {dimension_semantics = [#tpu.dimension_semantics<arbitrary>], iteration_bounds = array<i64: 1>, scalar_prefetch = 0 : i64, scratch_operands = 0 : i64, tpu.core_type = #tpu.core_type<tc>, window_params = [{pipeline_mode = #tpu.pipeline_mode<synchronous>, transform_indices = @transform_0, window_bounds = array<i64: 16, 32>}, {pipeline_mode = #tpu.pipeline_mode<synchronous>, transform_indices = @transform_1, window_bounds = array<i64: 32, 64>}, {pipeline_mode = #tpu.pipeline_mode<synchronous>, transform_indices = @transform_2, window_bounds = array<i64: 1, 64>}, {pipeline_mode = #tpu.pipeline_mode<synchronous>, transform_indices = @transform_3, window_bounds = array<i64: 1, 64>}, {pipeline_mode = #tpu.pipeline_mode<synchronous>, transform_indices = @transform_4, window_bounds = array<i64: 64, 64>}, {pipeline_mode = #tpu.pipeline_mode<synchronous>, transform_indices = @transform_5, window_bounds = array<i64: 1, 64>}, {pipeline_mode = #tpu.pipeline_mode<synchronous>, transform_indices = @transform_6, window_bounds = array<i64: 1, 64>}, {pipeline_mode = #tpu.pipeline_mode<synchronous>, transform_indices = @transform_7, window_bounds = array<i64: 1, 64>}, {pipeline_mode = #tpu.pipeline_mode<synchronous>, transform_indices = @transform_8, window_bounds = array<i64: 16, 1>}]} {
    %c0 = arith.constant 0 : index
    %c0_0 = arith.constant 0 : index
    %0 = vector.load %arg1[%c0, %c0_0] : memref<16x32xbf16, #tpu.memory_space<vmem>>, vector<16x32xbf16>
    %c0_1 = arith.constant 0 : index
    %c0_2 = arith.constant 0 : index
    %1 = vector.load %arg2[%c0_1, %c0_2] : memref<32x64xbf16, #tpu.memory_space<vmem>>, vector<32x64xbf16>
    %cst = arith.constant dense<0.000000e+00> : vector<16x64xf32>
    %2 = tpu.matmul %0, %1, %cst {dimension_numbers = #tpu.dot_dimension_numbers<[1], [0], [0], [1], [0, 0, 1, 1], [], []>} : vector<16x32xbf16>, vector<32x64xbf16>, vector<16x64xf32> -> vector<16x64xf32>
    %cst_3 = arith.constant dense<0.000000e+00> : vector<64xf32>
    %3 = vector.multi_reduction <add>, %2, %cst_3 [0] : vector<16x64xf32> to vector<64xf32>
    %4 = vector.shape_cast %3 : vector<64xf32> to vector<1x64xf32>
    %5 = arith.mulf %2, %2 : vector<16x64xf32>
    %cst_4 = arith.constant dense<0.000000e+00> : vector<64xf32>
    %6 = vector.multi_reduction <add>, %5, %cst_4 [0] : vector<16x64xf32> to vector<64xf32>
    %7 = vector.shape_cast %6 : vector<64xf32> to vector<1x64xf32>
    %c0_5 = arith.constant 0 : index
    %c0_6 = arith.constant 0 : index
    %8 = vector.load %arg3[%c0_5, %c0_6] : memref<1x64xf32, #tpu.memory_space<vmem>>, vector<1x64xf32>
    %c0_7 = arith.constant 0 : index
    %c0_8 = arith.constant 0 : index
    %9 = vector.load %arg4[%c0_7, %c0_8] : memref<1x64xf32, #tpu.memory_space<vmem>>, vector<1x64xf32>
    %cst_9 = arith.constant 6.250000e-02 : f32
    %10 = vector.broadcast %cst_9 : f32 to vector<1x64xf32>
    %11 = arith.mulf %4, %10 : vector<1x64xf32>
    %cst_10 = arith.constant 6.250000e-02 : f32
    %12 = vector.broadcast %cst_10 : f32 to vector<1x64xf32>
    %13 = arith.mulf %7, %12 : vector<1x64xf32>
    %14 = arith.mulf %11, %11 : vector<1x64xf32>
    %15 = arith.subf %13, %14 : vector<1x64xf32>
    %cst_11 = arith.constant 0.000000e+00 : f32
    %16 = vector.broadcast %cst_11 : f32 to vector<1x64xf32>
    %17 = arith.maximumf %15, %16 : vector<1x64xf32>
    %cst_12 = arith.constant 9.99999974E-6 : f32
    %18 = vector.broadcast %cst_12 : f32 to vector<1x64xf32>
    %19 = arith.addf %17, %18 : vector<1x64xf32>
    %20 = math.rsqrt %19 : vector<1x64xf32>
    %21 = arith.mulf %8, %20 : vector<1x64xf32>
    %22 = arith.mulf %11, %21 : vector<1x64xf32>
    %23 = arith.subf %9, %22 : vector<1x64xf32>
    %24 = vector.broadcast %21 : vector<1x64xf32> to vector<16x64xf32>
    %25 = arith.mulf %2, %24 : vector<16x64xf32>
    %26 = vector.broadcast %23 : vector<1x64xf32> to vector<16x64xf32>
    %27 = arith.addf %25, %26 : vector<16x64xf32>
    %cst_13 = arith.constant 0.000000e+00 : f32
    %28 = vector.broadcast %cst_13 : f32 to vector<16x64xf32>
    %29 = arith.maximumf %27, %28 : vector<16x64xf32>
    %30 = arith.truncf %29 : vector<16x64xf32> to vector<16x64xbf16>
    %c0_14 = arith.constant 0 : index
    %c0_15 = arith.constant 0 : index
    %31 = vector.load %arg5[%c0_14, %c0_15] : memref<64x64xbf16, #tpu.memory_space<vmem>>, vector<64x64xbf16>
    %cst_16 = arith.constant dense<0.000000e+00> : vector<16x64xf32>
    %32 = tpu.matmul %30, %31, %cst_16 {dimension_numbers = #tpu.dot_dimension_numbers<[1], [0], [0], [1], [0, 0, 1, 1], [], []>} : vector<16x64xbf16>, vector<64x64xbf16>, vector<16x64xf32> -> vector<16x64xf32>
    %cst_17 = arith.constant dense<0.000000e+00> : vector<64xf32>
    %33 = vector.multi_reduction <add>, %32, %cst_17 [0] : vector<16x64xf32> to vector<64xf32>
    %34 = vector.shape_cast %33 : vector<64xf32> to vector<1x64xf32>
    %35 = arith.mulf %32, %32 : vector<16x64xf32>
    %cst_18 = arith.constant dense<0.000000e+00> : vector<64xf32>
    %36 = vector.multi_reduction <add>, %35, %cst_18 [0] : vector<16x64xf32> to vector<64xf32>
    %37 = vector.shape_cast %36 : vector<64xf32> to vector<1x64xf32>
    %c0_19 = arith.constant 0 : index
    %c0_20 = arith.constant 0 : index
    %38 = vector.load %arg6[%c0_19, %c0_20] : memref<1x64xf32, #tpu.memory_space<vmem>>, vector<1x64xf32>
    %c0_21 = arith.constant 0 : index
    %c0_22 = arith.constant 0 : index
    %39 = vector.load %arg7[%c0_21, %c0_22] : memref<1x64xf32, #tpu.memory_space<vmem>>, vector<1x64xf32>
    %cst_23 = arith.constant 6.250000e-02 : f32
    %40 = vector.broadcast %cst_23 : f32 to vector<1x64xf32>
    %41 = arith.mulf %34, %40 : vector<1x64xf32>
    %cst_24 = arith.constant 6.250000e-02 : f32
    %42 = vector.broadcast %cst_24 : f32 to vector<1x64xf32>
    %43 = arith.mulf %37, %42 : vector<1x64xf32>
    %44 = arith.mulf %41, %41 : vector<1x64xf32>
    %45 = arith.subf %43, %44 : vector<1x64xf32>
    %cst_25 = arith.constant 0.000000e+00 : f32
    %46 = vector.broadcast %cst_25 : f32 to vector<1x64xf32>
    %47 = arith.maximumf %45, %46 : vector<1x64xf32>
    %cst_26 = arith.constant 9.99999974E-6 : f32
    %48 = vector.broadcast %cst_26 : f32 to vector<1x64xf32>
    %49 = arith.addf %47, %48 : vector<1x64xf32>
    %50 = math.rsqrt %49 : vector<1x64xf32>
    %51 = arith.mulf %38, %50 : vector<1x64xf32>
    %52 = arith.mulf %41, %51 : vector<1x64xf32>
    %53 = arith.subf %39, %52 : vector<1x64xf32>
    %54 = vector.broadcast %51 : vector<1x64xf32> to vector<16x64xf32>
    %55 = arith.mulf %32, %54 : vector<16x64xf32>
    %56 = vector.broadcast %53 : vector<1x64xf32> to vector<16x64xf32>
    %57 = arith.addf %55, %56 : vector<16x64xf32>
    %cst_27 = arith.constant 0.000000e+00 : f32
    %58 = vector.broadcast %cst_27 : f32 to vector<16x64xf32>
    %59 = arith.maximumf %57, %58 : vector<16x64xf32>
    %c0_28 = arith.constant 0 : index
    %c0_29 = arith.constant 0 : index
    %60 = vector.load %arg8[%c0_28, %c0_29] : memref<1x64xf32, #tpu.memory_space<vmem>>, vector<1x64xf32>
    %61 = vector.broadcast %60 : vector<1x64xf32> to vector<16x64xf32>
    %62 = arith.mulf %59, %61 : vector<16x64xf32>
    %cst_30 = arith.constant dense<0.000000e+00> : vector<16xf32>
    %63 = vector.multi_reduction <add>, %62, %cst_30 [1] : vector<16x64xf32> to vector<16xf32>
    %64 = vector.shape_cast %63 : vector<16xf32> to vector<16x1xf32>
    %cst_31 = arith.constant 0.000000e+00 : f32
    %65 = vector.broadcast %cst_31 : f32 to vector<16x1xf32>
    %66 = arith.subf %65, %64 : vector<16x1xf32>
    %67 = math.exp %66 : vector<16x1xf32>
    %cst_32 = arith.constant 1.000000e+00 : f32
    %68 = vector.broadcast %cst_32 : f32 to vector<16x1xf32>
    %69 = arith.addf %68, %67 : vector<16x1xf32>
    %70 = tpu.reciprocal %69 {approx = true} : vector<16x1xf32> -> vector<16x1xf32>
    %c0_33 = arith.constant 0 : index
    %c0_34 = arith.constant 0 : index
    %71 = vector.load %arg9[%c0_33, %c0_34] : memref<16x1xf32, #tpu.memory_space<vmem>>, vector<16x1xf32>
    tpu.vector_store %arg9[%c0_33, %c0_34], %70 {strides = array<i32>} : memref<16x1xf32, #tpu.memory_space<vmem>>, vector<16x1xf32>,
    return
  }
  func.func @transform_0(%arg0: i32) -> (i32, i32) {
    %c0_i32 = arith.constant 0 : i32
    %c0_i32_0 = arith.constant 0 : i32
    %c0_i32_1 = arith.constant 0 : i32
    return %c0_i32, %c0_i32_0 : i32, i32
  }
  func.func @transform_1(%arg0: i32) -> (i32, i32) {
    %c0_i32 = arith.constant 0 : i32
    %c0_i32_0 = arith.constant 0 : i32
    %c0_i32_1 = arith.constant 0 : i32
    return %c0_i32, %c0_i32_0 : i32, i32
  }
  func.func @transform_2(%arg0: i32) -> (i32, i32) {
    %c0_i32 = arith.constant 0 : i32
    %c0_i32_0 = arith.constant 0 : i32
    %c0_i32_1 = arith.constant 0 : i32
    return %c0_i32, %c0_i32_0 : i32, i32
  }
  func.func @transform_3(%arg0: i32) -> (i32, i32) {
    %c0_i32 = arith.constant 0 : i32
    %c0_i32_0 = arith.constant 0 : i32
    %c0_i32_1 = arith.constant 0 : i32
    return %c0_i32, %c0_i32_0 : i32, i32
  }
  func.func @transform_4(%arg0: i32) -> (i32, i32) {
    %c0_i32 = arith.constant 0 : i32
    %c0_i32_0 = arith.constant 0 : i32
    %c0_i32_1 = arith.constant 0 : i32
    return %c0_i32, %c0_i32_0 : i32, i32
  }
  func.func @transform_5(%arg0: i32) -> (i32, i32) {
    %c0_i32 = arith.constant 0 : i32
    %c0_i32_0 = arith.constant 0 : i32
    %c0_i32_1 = arith.constant 0 : i32
    return %c0_i32, %c0_i32_0 : i32, i32
  }
  func.func @transform_6(%arg0: i32) -> (i32, i32) {
    %c0_i32 = arith.constant 0 : i32
    %c0_i32_0 = arith.constant 0 : i32
    %c0_i32_1 = arith.constant 0 : i32
    return %c0_i32, %c0_i32_0 : i32, i32
  }
  func.func @transform_7(%arg0: i32) -> (i32, i32) {
    %c0_i32 = arith.constant 0 : i32
    %c0_i32_0 = arith.constant 0 : i32
    %c0_i32_1 = arith.constant 0 : i32
    return %c0_i32, %c0_i32_0 : i32, i32
  }
  func.func @transform_8(%arg0: i32) -> (i32, i32) {
    %c0_i32 = arith.constant 0 : i32
    %c0_i32_0 = arith.constant 0 : i32
    %c0_i32_1 = arith.constant 0 : i32
    return %c0_i32, %c0_i32_0 : i32, i32
  }
}

</mosaic_0001>

<bundles_post_ra>
// kernel: tpu_custom_call.1
= control target key start
LH: loop header
LB: loop body
LE: loop exit
PB: predicated region body
PF: predicated region fallthrough
CT: control target
= control target key end

     0   :  { %13 = vsyncpa [#allocation3], 0  ;;  %s917_s0 = inlined_call_operand.hbm [shape: bf16[16,32], index: 0, kind: input, shape index: {}]   ;;  %s918_s1 = inlined_call_operand.hbm [shape: bf16[32,64], index: 1, kind: input, shape index: {}]   ;;  %s919_s2 = inlined_call_operand.hbm [shape: f32[1,64], index: 2, kind: input, shape index: {}]   ;;  %s920_s3 = inlined_call_operand.hbm [shape: f32[1,64], index: 3, kind: input, shape index: {}]   ;;  %s921_s4 = inlined_call_operand.hbm [shape: bf16[64,64], index: 4, kind: input, shape index: {}]   ;;  %s922_s5 = inlined_call_operand.hbm [shape: f32[1,64], index: 5, kind: input, shape index: {}]   ;;  %s923_s6 = inlined_call_operand.hbm [shape: f32[1,64], index: 6, kind: input, shape index: {}]   ;;  %s924_s7 = inlined_call_operand.hbm [shape: f32[1,64], index: 7, kind: input, shape index: {}]   ;;  %s925_s8 = inlined_call_operand.hbm [shape: f32[16,1], index: 8, kind: output, shape index: {}]  }
   0x1   :  { %14 = vsyncpa [#allocation6], 0 }
   0x2   :  { %15 = vsyncpa [#allocation9], 0 }
   0x3   :  { %16 = vsyncpa [#allocation12], 0 }
   0x4   :  { %17 = vsyncpa [#allocation15], 0 }
   0x5   :  { %18 = vsyncpa [#allocation4], 0  ;;  %s707_s27 = smov [#allocation5]   ;;  %s708_s29 = smov [#allocation8]  }
   0x6   :  { %s36_s28 = sshll.u32 %s707_s27, 4  ;;  %s59_s30 = sshll.u32 %s708_s29, 4  ;;  %s37_s28 = int_to_ptr.vmem [resolvable:$true] %s36_s28  ;;  %s767_s30 = int_to_ptr.vmem [resolvable:$true] %s59_s30 }
   0x7   :  { %s497_s11 = scalar_lea.hbm %s918_s1, 256 }
   0x8   :  { %p498_p0 = scmp.ne.s32.totalorder %s918_s1, %s497_s11  ;;  %p501_p1 = scmp.lt.u32.totalorder %s497_s11, %s918_s1 }
   0xa   :  { %p503_p2 = pnand %p501_p1, %p498_p0 }
   0xc   :  { %506 = shalt.err (!%p503_p2)
}
   0xd   :  { %s507_s16 = scalar_lea.vmem %s37_s28, 256  ;;  %p512_p4 = scmp.lt.s32.totalorder %s37_s28, %s37_s28 }
   0xe   :  { %p508_p3 = scmp.ne.s32.totalorder %s37_s28, %s507_s16  ;;  %p513_p5 = scmp.lt.s32.totalorder %s507_s16, %s507_s16 }
  0x10   :  { %p514_p6 = por %p513_p5, %p512_p4 }
  0x12   :  { %p515_p7 = pnand %p514_p6, %p508_p3 }
  0x14   :  { %518 = shalt.err (!%p515_p7)
}
  0x15   :  { %s709_s17 = smov 64   ;;  %s710_s18 = smov 4  }
  0x16   :  { %42 = dma.hbm_to_vmem [thread:$0]  %s918_s1, 256, %s37_s28, [#allocation6], %s709_s17, %s709_s17, %s710_s18  }
  0x17   :  { %s519_s23 = scalar_lea.hbm %s920_s3, 16 }
  0x18   :  { %p520_p8 = scmp.ne.s32.totalorder %s920_s3, %s519_s23  ;;  %p523_p9 = scmp.lt.u32.totalorder %s519_s23, %s920_s3 }
  0x1a   :  { %p525_p10 = pnand %p523_p9, %p520_p8 }
  0x1c   :  { %528 = shalt.err (!%p525_p10)
}
  0x1d   :  { %s529_s29 = scalar_lea.vmem %s767_s30, 16  ;;  %s533_s1 = scalar_lea.vmem %s767_s30, 32 }
  0x1e   :  { %p530_p11 = scmp.ne.s32.totalorder %s767_s30, %s529_s29  ;;  %p534_p12 = scmp.lt.s32.totalorder %s767_s30, %s767_s30 }
  0x1f   :  { %p535_p13 = scmp.lt.s32.totalorder %s533_s1, %s529_s29 }
  0x21   :  { %p536_p0 = por %p535_p13, %p534_p12 }
  0x23   :  { %p537_p1 = pnand %p536_p0, %p530_p11 }
  0x25   :  { %540 = shalt.err (!%p537_p1)
}
  0x26   :  { %62 = dma.hbm_to_vmem [thread:$0]  %s920_s3, 16, %s767_s30, [#allocation9]  }
  0x27   :  { %s711_s10 = smov [#allocation11]   ;;  %s712_s12 = smov [#allocation2]  }
  0x28   :  { %s81_s11 = sshll.u32 %s711_s10, 4  ;;  %s24_s13 = sshll.u32 %s712_s12, 4  ;;  %s82_s11 = int_to_ptr.vmem [resolvable:$true] %s81_s11  ;;  %s802_s13 = int_to_ptr.vmem [resolvable:$true] %s24_s13 }
  0x29   :  { %s541_s16 = scalar_lea.hbm %s922_s5, 16 }
  0x2a   :  { %p542_p2 = scmp.ne.s32.totalorder %s922_s5, %s541_s16  ;;  %p545_p3 = scmp.lt.u32.totalorder %s541_s16, %s922_s5 }
  0x2c   :  { %p547_p4 = pnand %p545_p3, %p542_p2 }
  0x2e   :  { %550 = shalt.err (!%p547_p4)
}
  0x2f   :  { %s551_s3 = scalar_lea.vmem %s82_s11, 16  ;;  %s555_s30 = scalar_lea.vmem %s82_s11, 32 }
  0x30   :  { %p552_p5 = scmp.ne.s32.totalorder %s82_s11, %s551_s3  ;;  %p556_p6 = scmp.lt.s32.totalorder %s82_s11, %s82_s11 }
  0x31   :  { %p557_p7 = scmp.lt.s32.totalorder %s555_s30, %s551_s3 }
  0x33   :  { %p558_p8 = por %p557_p7, %p556_p6 }
  0x35   :  { %p559_p9 = pnand %p558_p8, %p552_p5 }
  0x37   :  { %562 = shalt.err (!%p559_p9)
}
  0x38   :  { %84 = dma.hbm_to_vmem [thread:$0]  %s922_s5, 16, %s82_s11, [#allocation12]  }
  0x39   :  { %s563_s27 = scalar_lea.hbm %s917_s0, 128 }
  0x3a   :  { %p564_p10 = scmp.ne.s32.totalorder %s917_s0, %s563_s27  ;;  %p567_p11 = scmp.lt.u32.totalorder %s563_s27, %s917_s0 }
  0x3c   :  { %p569_p12 = pnand %p567_p11, %p564_p10 }
  0x3e   :  { %572 = shalt.err (!%p569_p12)
}
  0x3f   :  { %s573_s10 = scalar_lea.vmem %s802_s13, 128  ;;  %p578_p0 = scmp.lt.s32.totalorder %s802_s13, %s802_s13 }
  0x40   :  { %p574_p13 = scmp.ne.s32.totalorder %s802_s13, %s573_s10  ;;  %p579_p1 = scmp.lt.s32.totalorder %s573_s10, %s573_s10 }
  0x42   :  { %p580_p2 = por %p579_p1, %p578_p0 }
  0x44   :  { %p581_p3 = pnand %p580_p2, %p574_p13 }
  0x46   :  { %584 = shalt.err (!%p581_p3)
}
  0x47   :  { %30 = dma.hbm_to_vmem [thread:$0]  %s917_s0, 128, %s802_s13, [#allocation3], %s709_s17, %s709_s17, %s710_s18  }
  0x48   :  { %s713_s12 = smov [#allocation7]   ;;  %s714_s15 = smov [#allocation10]  }
  0x49   :  { %s49_s14 = sshll.u32 %s713_s12, 4  ;;  %s68_s16 = sshll.u32 %s714_s15, 4  ;;  %s50_s14 = int_to_ptr.vmem [resolvable:$true] %s49_s14  ;;  %s836_s16 = int_to_ptr.vmem [resolvable:$true] %s68_s16 }
  0x4a   :  { %s585_s21 = scalar_lea.hbm %s919_s2, 16 }
  0x4b   :  { %p586_p4 = scmp.ne.s32.totalorder %s919_s2, %s585_s21  ;;  %p589_p5 = scmp.lt.u32.totalorder %s585_s21, %s919_s2 }
  0x4d   :  { %p591_p6 = pnand %p589_p5, %p586_p4 }
  0x4f   :  { %594 = shalt.err (!%p591_p6)
}
  0x50   :  { %s595_s0 = scalar_lea.vmem %s50_s14, 16  ;;  %s599_s13 = scalar_lea.vmem %s50_s14, 32 }
  0x51   :  { %p596_p7 = scmp.ne.s32.totalorder %s50_s14, %s595_s0  ;;  %p600_p8 = scmp.lt.s32.totalorder %s50_s14, %s50_s14 }
  0x52   :  { %p601_p9 = scmp.lt.s32.totalorder %s599_s13, %s595_s0 }
  0x54   :  { %p602_p10 = por %p601_p9, %p600_p8 }
  0x56   :  { %p603_p11 = pnand %p602_p10, %p596_p7 }
  0x58   :  { %606 = shalt.err (!%p603_p11)
}
  0x59   :  { %52 = dma.hbm_to_vmem [thread:$0]  %s919_s2, 16, %s50_s14, [#allocation6]  }
  0x5a   :  { %s607_s29 = scalar_lea.hbm %s921_s4, 512 }
  0x5b   :  { %p608_p12 = scmp.ne.s32.totalorder %s921_s4, %s607_s29  ;;  %p611_p13 = scmp.lt.u32.totalorder %s607_s29, %s921_s4 }
  0x5d   :  { %p613_p0 = pnand %p611_p13, %p608_p12 }
  0x5f   :  { %616 = shalt.err (!%p613_p0)
}
  0x60   :  { %s617_s5 = scalar_lea.vmem %s836_s16, 512  ;;  %p622_p2 = scmp.lt.s32.totalorder %s836_s16, %s836_s16 }
  0x61   :  { %p618_p1 = scmp.ne.s32.totalorder %s836_s16, %s617_s5  ;;  %p623_p3 = scmp.lt.s32.totalorder %s617_s5, %s617_s5 }
  0x63   :  { %p624_p4 = por %p623_p3, %p622_p2 }
  0x65   :  { %p625_p5 = pnand %p624_p4, %p618_p1 }
  0x67   :  { %628 = shalt.err (!%p625_p5)
}
  0x68   :  { %74 = dma.hbm_to_vmem [thread:$0]  %s921_s4, 512, %s836_s16, [#allocation9], %s709_s17, %s709_s17, %s710_s18  }
  0x69   :  { %s715_s12 = smov [#allocation13]   ;;  %s716_s15 = smov [#allocation14]  }
  0x6a   :  { %s91_s14 = sshll.u32 %s715_s12, 4  ;;  %s101_s19 = sshll.u32 %s716_s15, 4  ;;  %s92_s14 = int_to_ptr.vmem [resolvable:$true] %s91_s14  ;;  %s102_s19 = int_to_ptr.vmem [resolvable:$true] %s101_s19 }
  0x6b   :  { %s629_s22 = scalar_lea.hbm %s923_s6, 16 }
  0x6c   :  { %p630_p6 = scmp.ne.s32.totalorder %s923_s6, %s629_s22  ;;  %p633_p7 = scmp.lt.u32.totalorder %s629_s22, %s923_s6 }
  0x6e   :  { %p635_p8 = pnand %p633_p7, %p630_p6 }
  0x70   :  { %638 = shalt.err (!%p635_p8)
}
  0x71   :  { %s639_s4 = scalar_lea.vmem %s92_s14, 16  ;;  %s643_s17 = scalar_lea.vmem %s92_s14, 32 }
  0x72   :  { %p640_p9 = scmp.ne.s32.totalorder %s92_s14, %s639_s4  ;;  %p644_p10 = scmp.lt.s32.totalorder %s92_s14, %s92_s14 }
  0x73   :  { %p645_p11 = scmp.lt.s32.totalorder %s643_s17, %s639_s4 }
  0x75   :  { %p646_p12 = por %p645_p11, %p644_p10 }
  0x77   :  { %p647_p13 = pnand %p646_p12, %p640_p9 }
  0x79   :  { %650 = shalt.err (!%p647_p13)
}
  0x7a   :  { %94 = dma.hbm_to_vmem [thread:$0]  %s923_s6, 16, %s92_s14, [#allocation12]  }
  0x7b   :  { %s651_s25 = scalar_lea.hbm %s924_s7, 16 }
  0x7c   :  { %p652_p0 = scmp.ne.s32.totalorder %s924_s7, %s651_s25  ;;  %p655_p1 = scmp.lt.u32.totalorder %s651_s25, %s924_s7 }
  0x7e   :  { %p657_p2 = pnand %p655_p1, %p652_p0 }
  0x80   :  { %660 = shalt.err (!%p657_p2)
}
  0x81   :  { %s661_s28 = scalar_lea.vmem %s102_s19, 16  ;;  %s665_s9 = scalar_lea.vmem %s102_s19, 32 }
  0x82   :  { %p662_p3 = scmp.ne.s32.totalorder %s102_s19, %s661_s28  ;;  %p666_p4 = scmp.lt.s32.totalorder %s102_s19, %s102_s19 }
  0x83   :  { %p667_p5 = scmp.lt.s32.totalorder %s665_s9, %s661_s28 }
  0x85   :  { %p668_p6 = por %p667_p5, %p666_p4 }
  0x87   :  { %p669_p7 = pnand %p668_p6, %p662_p3 }
  0x89   :  { %672 = shalt.err (!%p669_p7)
}
  0x8a   :  { %104 = dma.hbm_to_vmem [thread:$0]  %s924_s7, 16, %s102_s19, [#allocation15]  }
  0x8b   :  { %695 = dma.done.wait [#allocation3], 128  }
  0x8c   :  { %696 = vsyncadd [#allocation3], 4294967168 }
  0x8d   :  { %697 = dma.done.wait [#allocation6], 272  }
  0x8e   :  { %698 = vsyncadd [#allocation6], 4294967024 }
  0x8f   :  { %699 = dma.done.wait [#allocation9], 528  }
  0x90   :  { %700 = vsyncadd [#allocation9], 4294966768 }
  0x91   :  { %701 = dma.done.wait [#allocation12], 32  }
  0x92   :  { %702 = vsyncadd [#allocation12], 4294967264 }
  0x93   :  { %703 = dma.done.wait [#allocation15], 16  }
  0x94   :  { %704 = vsyncadd [#allocation15], 4294967280  ;;  %v717_v0 = vmov 0.0   ;;  %vm718_vm0 = vmmov 0   ;;  %v478_v1 = vld [vmem:[#allocation5] sm:$0xff]   ;;  %v479_v2 = vld [vmem:[#allocation5 + $0x8] sm:$0xff]   ;;  %v232_v38 = vlaneseq }
  0x95   :  { %443 = vmatprep.subr.bf16.mxu0 %v717_v0  ;;  %447 = vmatprep.mubr.msk.bf16.mxu0 %vm718_vm0, %v717_v0  ;;  %v480_v3 = vld [vmem:[#allocation2] sm:$0xff]   ;;  %vm153_vm1 = vcmask 261120   ;;  %v483_v6 = vld [vmem:[#allocation10 + $0x10] sm:$0xff]   ;;  %v484_v7 = vld [vmem:[#allocation10 + $0x18] sm:$0xff]   ;;  %vm198_vm2 = vcmask 523264   ;;  %vm401_vm3 = vcmask 7168  }
  0x96   :  { %451 = vmatprep.subr.bf16.mxu1 %v717_v0  ;;  %459 = vmatprep.mubr.msk.bf16.mxu1 %vm718_vm0, %v717_v0  ;;  %v481_v4 = vld [vmem:[#allocation10] sm:$0xff]   ;;  %v482_v5 = vld [vmem:[#allocation10 + $0x8] sm:$0xff]   ;;  %v233_v39 = vshrl.u32 %v232_v38, 7  ;;  %v219_v40 = vld [vmem:[#allocation7] sm:$0x1]  ;;  %s719_s7 = smov [#allocation16]  }
  0x97   :  { %444 = vmatpush3.bf16.msra.mxu0 %v478_v1  ;;  %452 = vmatpush3.bf16.msra.mxu1 %v481_v4  ;;  %v220_v44 = vld [vmem:[#allocation8] sm:$0x1]  ;;  %s409_s5 = sshll.u32 %s719_s7, 4  ;;  %s410_s5 = int_to_ptr.vmem [resolvable:$true] %s409_s5 }
  0x98   :  { %445 = vmatprep.subr.bf16.mxu0 %v717_v0  ;;  %453 = vmatprep.subr.bf16.mxu1 %v717_v0  ;;  %v234_v41 = vsub.s32 0, %v233_v39  ;;  %s673_s2 = scalar_lea.vmem %s410_s5, 256  ;;  %p678_p9 = scmp.lt.s32.totalorder %s410_s5, %s410_s5 }
  0x99   :  { %p674_p8 = scmp.ne.s32.totalorder %s410_s5, %s673_s2  ;;  %p679_p10 = scmp.lt.s32.totalorder %s673_s2, %s673_s2 }
  0x9b   :  { %446 = vmatpush3.bf16.msra.mxu0 %v479_v2  ;;  %454 = vmatpush3.bf16.msra.mxu1 %v482_v5  ;;  %p680_p11 = por %p679_p10, %p678_p9 }
  0x9c   :  { %455 = vmatprep.subr.bf16.mxu1 %v717_v0 }
  0x9d   :  { %p681_p12 = pnand %p680_p11, %p674_p8 }
  0x9e   :  { %448 = vmatmul.mubr.msk.bf16.vlgmr.msra.gmra.mrb[0].mxu0 %vm153_vm1, %v480_v3 }
  0x9f   :  { %456 = vmatpush3.bf16.msra.mxu1 %v483_v6 }
  0xa0   :  { %457 = vmatprep.subr.bf16.mxu1 %v717_v0 }
  0xa3   :  { %458 = vmatpush3.bf16.msra.mxu1 %v484_v7 }
 0x171   :  { %v191_v8 = vpop.f32.mrb[0].mxu0 }
 0x172   :  { %v208_v9 = vmul.f32 %v191_v8, %v191_v8  ;;  %v449_v10 = vpop.f32.mrb[1].mxu0  ;;  %v199_v12 = vsel %vm198_vm2, %v191_v8, 0.0 }
 0x173   :  { %v194_v11 = vpop.f32.mrb[2].mxu0 }
 0x174   :  { %v200_v13 = vsel %vm198_vm2, %v194_v11, 0.0  ;;  %v209_v14 = vmul.f32 %v194_v11, %v194_v11  ;;  %v450_v15 = vpop.f32.mrb[3].mxu0  ;;  %v210_v17 = vsel %vm198_vm2, %v208_v9, 0.0 }
 0x175   :  { %v201_v16 = vadd.f32 %v200_v13, %v199_v12 }
 0x176   :  { %v211_v18 = vsel %vm198_vm2, %v209_v14, 0.0 }
 0x177   :  { %v202_v19 = vrot.slane %v201_v16, 4  ;;  %v212_v20 = vadd.f32 %v211_v18, %v210_v17 }
 0x179   :  { %v203_v21 = vadd.f32 %v202_v19, %v201_v16  ;;  %v213_v22 = vrot.slane %v212_v20, 4 }
 0x17b   :  { %v204_v23 = vrot.slane %v203_v21, 2  ;;  %v214_v24 = vadd.f32 %v213_v22, %v212_v20  ;;  %v346_v22 = vld [vmem:[#allocation11] sm:$0x1] }
 0x17d   :  { %v205_v25 = vadd.f32 %v204_v23, %v203_v21  ;;  %v215_v26 = vrot.slane %v214_v24, 2 }
 0x17f   :  { %v206_v27 = vrot.slane %v205_v25, 1  ;;  %v216_v28 = vadd.f32 %v215_v26, %v214_v24 }
 0x181   :  { %v207_v29 = vadd.f32 %v206_v27, %v205_v25  ;;  %v217_v30 = vrot.slane %v216_v28, 1  ;;  %v347_v25 = vld [vmem:[#allocation13] sm:$0x1] }
 0x183   :  { %v218_v31 = vadd.f32 %v217_v30, %v216_v28  ;;  %v221_v32 = vmul.f32 0.0625, %v207_v29 }
 0x185   :  { %v222_v33 = vmul.f32 0.0625, %v218_v31  ;;  %v223_v34 = vmul.f32 %v221_v32, %v221_v32 }
 0x187   :  { %v224_v35 = vsub.f32 %v222_v33, %v223_v34  ;;  %v434_v34 = vld [vmem:[#allocation14] ss:$0 sm:$0xff] }
 0x189   :  { %v225_v36 = vmax.f32 %v224_v35, 0.0 }
 0x18b   :  { %v226_v37 = vadd.f32 1e-05, %v225_v36 }
 0x18d   :  { %485 = vrsqrt.f32 %v226_v37 }
 0x197   :  { %v486_v42 = vpop.eup %485 }
 0x198   :  { %v228_v43 = vmul.f32 %v486_v42, %v219_v40 }
 0x19a   :  { %v229_v45 = vmul.f32 %v228_v43, %v221_v32  ;;  %v235_v46 = vrot.slane %v228_v43, %v234_v41 }
 0x19c   :  { %v230_v47 = vsub.f32 %v220_v44, %v229_v45  ;;  %v237_v48 = vmul.f32 %v235_v46, %v191_v8  ;;  %v238_v49 = vmul.f32 %v235_v46, %v194_v11 }
 0x19e   :  { %v243_v50 = vrot.slane %v230_v47, %v234_v41 }
 0x1a0   :  { %v245_v51 = vadd.f32 %v243_v50, %v237_v48  ;;  %v246_v52 = vadd.f32 %v243_v50, %v238_v49 }
 0x1a2   :  { %v248_v53 = vmax.f32 %v246_v52, 0.0  ;;  %v247_v54 = vmax.f32 %v245_v51, 0.0 }
 0x1a4   :  { %v249_v55 = vpack.c.bf16 %v248_v53, %v247_v54 }
 0x1a6   :  { %460 = vmatmul.mubr.msk.bf16.vlgmr.msra.gmra.mrb[0].mxu1 %vm198_vm2, %v249_v55 }
 0x279   :  { %v319_v56 = vpop.f32.mrb[0].mxu1 }
 0x27a   :  { %v335_v57 = vmul.f32 %v319_v56, %v319_v56  ;;  %v461_v58 = vpop.f32.mrb[1].mxu1  ;;  %v326_v60 = vsel %vm198_vm2, %v319_v56, 0.0 }
 0x27b   :  { %v322_v59 = vpop.f32.mrb[2].mxu1 }
 0x27c   :  { %v327_v61 = vsel %vm198_vm2, %v322_v59, 0.0  ;;  %v336_v62 = vmul.f32 %v322_v59, %v322_v59  ;;  %v462_v63 = vpop.f32.mrb[3].mxu1  ;;  %v337_v1 = vsel %vm198_vm2, %v335_v57, 0.0 }
 0x27d   :  { %v328_v0 = vadd.f32 %v327_v61, %v326_v60 }
 0x27e   :  { %v338_v2 = vsel %vm198_vm2, %v336_v62, 0.0 }
 0x27f   :  { %v329_v3 = vrot.slane %v328_v0, 4  ;;  %v339_v4 = vadd.f32 %v338_v2, %v337_v1 }
 0x281   :  { %v330_v5 = vadd.f32 %v329_v3, %v328_v0  ;;  %v340_v6 = vrot.slane %v339_v4, 4 }
 0x283   :  { %v331_v7 = vrot.slane %v330_v5, 2  ;;  %v341_v8 = vadd.f32 %v340_v6, %v339_v4 }
 0x285   :  { %v332_v9 = vadd.f32 %v331_v7, %v330_v5  ;;  %v342_v10 = vrot.slane %v341_v8, 2 }
 0x287   :  { %v333_v11 = vrot.slane %v332_v9, 1  ;;  %v343_v12 = vadd.f32 %v342_v10, %v341_v8 }
 0x289   :  { %v334_v13 = vadd.f32 %v333_v11, %v332_v9  ;;  %v344_v14 = vrot.slane %v343_v12, 1 }
 0x28b   :  { %v345_v15 = vadd.f32 %v344_v14, %v343_v12  ;;  %v348_v16 = vmul.f32 0.0625, %v334_v13 }
 0x28d   :  { %v349_v17 = vmul.f32 0.0625, %v345_v15  ;;  %v350_v18 = vmul.f32 %v348_v16, %v348_v16 }
 0x28f   :  { %v351_v19 = vsub.f32 %v349_v17, %v350_v18 }
 0x291   :  { %v352_v20 = vmax.f32 %v351_v19, 0.0 }
 0x293   :  { %v353_v21 = vadd.f32 1e-05, %v352_v20 }
 0x295   :  { %487 = vrsqrt.f32 %v353_v21 }
 0x29f   :  { %v488_v23 = vpop.eup %487 }
 0x2a0   :  { %v355_v24 = vmul.f32 %v488_v23, %v346_v22 }
 0x2a2   :  { %v356_v26 = vmul.f32 %v355_v24, %v348_v16  ;;  %v362_v27 = vrot.slane %v355_v24, %v234_v41 }
 0x2a4   :  { %v365_v28 = vmul.f32 %v362_v27, %v322_v59  ;;  %v357_v29 = vsub.f32 %v347_v25, %v356_v26  ;;  %v364_v30 = vmul.f32 %v362_v27, %v319_v56 }
 0x2a6   :  { %v370_v31 = vrot.slane %v357_v29, %v234_v41 }
 0x2a8   :  { %v372_v32 = vadd.f32 %v370_v31, %v364_v30  ;;  %v373_v33 = vadd.f32 %v370_v31, %v365_v28 }
 0x2aa   :  { %v374_v35 = vmax.f32 %v372_v32, 0.0  ;;  %v375_v36 = vmax.f32 %v373_v33, 0.0 }
 0x2ac   :  { %v383_v37 = vmul.f32 %v434_v34, %v374_v35  ;;  %v384_v39 = vmul.f32 %v434_v34, %v375_v36 }
 0x2ae   :  { %v385_v38 = vsel %vm198_vm2, %v383_v37, 0.0  ;;  %v388_v40 = vsel %vm198_vm2, %v384_v39, 0.0 }
 0x2af   :  { %386 = vadd.xlane.f32.xlu0 %v385_v38 }
 0x2b3   :  { %389 = vadd.xlane.f32.xlu0 %v388_v40 }
 0x33c   :  { %v387_v42 = vpop.xlane.xlu0 %386 }
 0x33d   :  { %v391_v43 = vsub.f32 0.0, %v387_v42 }
 0x33f   :  { %v393_v44 = vmul.f32 1.442695, %v391_v43 }
 0x340   :  { %v390_v45 = vpop.xlane.xlu0 %389 }
 0x341   :  { %489 = vpow2.f32 %v393_v44  ;;  %v392_v46 = vsub.f32 0.0, %v390_v45 }
 0x343   :  { %v395_v41 = vmul.f32 1.442695, %v392_v46 }
 0x345   :  { %491 = vpow2.f32 %v395_v41 }
 0x34b   :  { %v490_v47 = vpop.eup %489 }
 0x34c   :  { %v397_v48 = vadd.f32 1.0, %v490_v47 }
 0x34e   :  { %493 = vrcp.f32 %v397_v48 }
 0x34f   :  { %v492_v49 = vpop.eup %491 }
 0x350   :  { %v398_v50 = vadd.f32 1.0, %v492_v49 }
 0x352   :  { %495 = vrcp.f32 %v398_v50 }
 0x358   :  { %v494_v51 = vpop.eup %493 }
 0x359   :  { %402 = vst.msk [vmem:[#allocation16] sm:$0xff] %vm401_vm3, %v494_v51 }
 0x35c   :  { %v496_v52 = vpop.eup %495 }
 0x35d   :  { %403 = vst.msk [vmem:[#allocation16 + $0x8] sm:$0xff] %vm401_vm3, %v496_v52 }
 0x35e   :  { %684 = shalt.err (!%p681_p12)
}
 0x35f   :  { %s685_s14 = scalar_lea.hbm %s925_s8, 256 }
 0x360   :  { %p686_p13 = scmp.ne.s32.totalorder %s925_s8, %s685_s14  ;;  %p689_p0 = scmp.lt.u32.totalorder %s685_s14, %s925_s8 }
 0x362   :  { %p691_p1 = pnand %p689_p0, %p686_p13 }
 0x364   :  { %694 = shalt.err (!%p691_p1)
}
 0x365   :  { %s720_s22 = smov 128   ;;  %s721_s3 = smov 8  }
 0x366   :  { %415 = dma.vmem_to_hbm [thread:$0]  %s410_s5, 256, %s925_s8, [#allocation4], %s720_s22, %s720_s22, %s721_s3  }
 0x367   :  { %705 = dma.done.wait [#allocation4], 256  }
 0x368   :  { %706 = vsyncadd [#allocation4], 4294967040 }
 0x369   :  { %419 = vsyncpa [#allocation3], 1 }
 0x36a   :  { %420 = vsyncpa [#allocation6], 1 }
 0x36b   :  { %421 = vsyncpa [#allocation9], 1 }
 0x36c   :  { %422 = vsyncpa [#allocation12], 1 }
 0x36d   :  { %423 = vsyncpa [#allocation15], 1 }
 0x36e   :  { %424 = vsyncpa [#allocation4], 1 }

</bundles_post_ra>
